<compile_context>
chip_gen: v5e
topology: v5e:2x2
jax: 0.10.0
libtpu: 0.0.40
codegen_flags: <defaults>
</compile_context>

<pallas_src>
import functools

import jax
import jax.numpy as jnp
from jax.experimental import pallas as pl
from jax.experimental.pallas import tpu as pltpu

BN_EPS = 1e-5
LANE = 128
_NEG_BIG = -1e30


def _round_up(n, m):
    return ((n + m - 1) // m) * m


def _tile(dim, pref, align):
    """Largest `align`-multiple divisor of `dim` that is <= pref (else the whole dim)."""
    if dim <= pref:
        return dim
    t = (pref // align) * align
    while t >= align:
        if dim % t == 0:
            return t
        t -= align
    return dim


def _compiler_params(dim_semantics, est_vmem_bytes):
    try:
        cap = getattr(pltpu.get_tpu_info(), "vmem_capacity_bytes", 128 * 1024 * 1024)
    except Exception:  # pragma: no cover - defensive (e.g. interpret mode)
        cap = 128 * 1024 * 1024
    limit = int(min(max(4 * int(est_vmem_bytes), 32 * 1024 * 1024), int(0.75 * cap)))
    return pltpu.CompilerParams(dimension_semantics=dim_semantics,
                                vmem_limit_bytes=limit)


# ----------------------------- kernels ------------------------------------- #

def _logits_stats_kernel(x_ref, w_ref, b_ref, logits_ref, sum_ref, sumsq_ref, acc_ref):
    """grid=(nb, nk). K-accumulated matmul + bias, fused per-class sum/sumsq partials."""
    k = pl.program_id(1)

    @pl.when(k == 0)
    def _():
        acc_ref[...] = jnp.zeros_like(acc_ref)

    acc_ref[...] += jnp.dot(x_ref[...], w_ref[...],
                            preferred_element_type=jnp.float32)

    @pl.when(k == pl.num_programs(1) - 1)
    def _():
        logits = acc_ref[...] + b_ref[...]                                   # (tm, Cp) f32
        logits_ref[...] = logits
        sum_ref[...] = jnp.sum(logits, axis=0, keepdims=True)[None]          # (1,1,Cp)
        sumsq_ref[...] = jnp.sum(logits * logits, axis=0, keepdims=True)[None]


def _bn_apply_kernel(num_valid, logits_ref, scale_ref, shift_ref, o_ref):
    """grid=(nb,). BN folded to one affine; output only the `num_valid` real classes."""
    y = logits_ref[...] * scale_ref[...] + shift_ref[...]        # (tm, Cp) f32
    o_ref[...] = y[:, :num_valid]                                # static slice -> (tm, C)


def _loss_kernel(num_valid, logits_ref, scale_ref, shift_ref, cw_ref, lbl_ref,
                 loss_ref, num_acc, den_acc):
    """grid=(nb,) sequential. Weighted CE: sum(w_y*nll)/sum(w_y) over all batch tiles."""
    i = pl.program_id(0)

    @pl.when(i == 0)
    def _():
        num_acc[...] = jnp.zeros_like(num_acc)
        den_acc[...] = jnp.zeros_like(den_acc)

    y = logits_ref[...] * scale_ref[...] + shift_ref[...]        # (tm, Cp) f32
    tm, cp = y.shape
    cls = jax.lax.broadcasted_iota(jnp.int32, (tm, cp), 1)
    y = jnp.where(cls < num_valid, y, _NEG_BIG)                  # mask padded classes

    m = jnp.max(y, axis=-1, keepdims=True)
    lse = m + jnp.log(jnp.sum(jnp.exp(y - m), axis=-1, keepdims=True))

    hit = cls == lbl_ref[...]                                    # (tm, Cp) bool
    true_logit = jnp.sum(jnp.where(hit, y, 0.0), axis=-1, keepdims=True)        # (tm,1)
    w_y = jnp.sum(jnp.where(hit, jnp.broadcast_to(cw_ref[...], (tm, cp)), 0.0),
                  axis=-1, keepdims=True)                                        # (tm,1)

    num_acc[...] += jnp.sum(w_y * (lse - true_logit), keepdims=True)             # (1,1)
    den_acc[...] += jnp.sum(w_y, keepdims=True)

    @pl.when(i == pl.num_programs(0) - 1)
    def _():
        loss_ref[...] = num_acc[...] / den_acc[...]


# ----------------------------- wrapper -------------------------------------- #

def prepare_params(w, b, gamma, beta, class_weight=None):
    """One-time parameter prep (outside the hot path): pad num_class to a lane
    multiple and pre-transpose fc1.weight so kernels see lane-dense (E, Cp) tiles."""
    C, E = w.shape
    Cp = _round_up(C, LANE)
    pad = Cp - C
    f32 = jnp.float32
    w_t = jnp.pad(w, ((0, pad), (0, 0))).T                     # (E, Cp), keeps w dtype
    b_p = jnp.pad(b.astype(f32), (0, pad)).reshape(1, Cp)
    g_p = jnp.pad(gamma.astype(f32), (0, pad), constant_values=1.0).reshape(1, Cp)
    be_p = jnp.pad(beta.astype(f32), (0, pad)).reshape(1, Cp)
    if class_weight is None:
        class_weight = jnp.ones((C,), f32)
    cw_p = jnp.pad(class_weight.astype(f32), (0, pad)).reshape(1, Cp)
    return dict(w_t=w_t, b=b_p, gamma=g_p, beta=be_p, cw=cw_p,
                num_class=C, padded_class=Cp)


def cce_forward(x, params, label=None, *, block_b=256, block_k=512):
    """Replicates CCE.forward: returns loss if label is given, else bn1(fc1(x))."""
    B, E = x.shape
    C = params["num_class"]
    Cp = params["padded_class"]
    w_t, b_p = params["w_t"], params["b"]
    assert w_t.shape == (E, Cp)

    x_bytes = jnp.dtype(x.dtype).itemsize
    w_bytes = jnp.dtype(w_t.dtype).itemsize
    tm = _tile(B, block_b, 16 if x_bytes < 4 else 8)
    tk = _tile(E, block_k, LANE)
    nb, nk = B // tm, E // tk

    # Phase 1: tiled matmul + bias, stash f32 logits, fused per-class sum / sumsq
    # partials per batch tile (BatchNorm1d stats must span the whole batch).
    est_vmem = 2 * (tm * tk * x_bytes + tk * Cp * w_bytes) + 4 * tm * Cp * 4
    logits, psum, psumsq = pl.pallas_call(
        _logits_stats_kernel,
        grid=(nb, nk),
        in_specs=[
            pl.BlockSpec((tm, tk), lambda i, k: (i, k)),   # x
            pl.BlockSpec((tk, Cp), lambda i, k: (k, 0)),   # w^T (padded)
            pl.BlockSpec((1, Cp), lambda i, k: (0, 0)),    # bias
        ],
        out_specs=[
            pl.BlockSpec((tm, Cp), lambda i, k: (i, 0)),       # logits stash
            pl.BlockSpec((1, 1, Cp), lambda i, k: (i, 0, 0)),  # partial sum
            pl.BlockSpec((1, 1, Cp), lambda i, k: (i, 0, 0)),  # partial sumsq
        ],
        out_shape=(
            jax.ShapeDtypeStruct((B, Cp), jnp.float32),
            jax.ShapeDtypeStruct((nb, 1, Cp), jnp.float32),
            jax.ShapeDtypeStruct((nb, 1, Cp), jnp.float32),
        ),
        scratch_shapes=[pltpu.VMEM((tm, Cp), jnp.float32)],
        compiler_params=_compiler_params(("parallel", "arbitrary"), est_vmem),
        cost_estimate=pl.CostEstimate(
            flops=2 * B * E * Cp,
            transcendentals=0,
            bytes_accessed=B * E * x_bytes + E * Cp * w_bytes + 2 * B * Cp * 4),
    )(x, w_t, b_p)

    # Tiny (1, Cp) reductions + BN affine fold: plain XLA glue, negligible.
    mean = jnp.sum(psum, axis=0) / B                                    # (1, Cp)
    var = jnp.maximum(jnp.sum(psumsq, axis=0) / B - mean * mean, 0.0)   # biased var
    scale = params["gamma"] * jax.lax.rsqrt(var + BN_EPS)
    shift = params["beta"] - mean * scale

    vec_spec = pl.BlockSpec((1, Cp), lambda i: (0, 0))
    row_spec = pl.BlockSpec((tm, Cp), lambda i: (i, 0))

    if label is None:
        # Phase 2a: BN affine applied in place, output written directly at (B, C).
        y = pl.pallas_call(
            functools.partial(_bn_apply_kernel, C),
            grid=(nb,),
            in_specs=[row_spec, vec_spec, vec_spec],
            out_specs=pl.BlockSpec((tm, C), lambda i: (i, 0)),
            out_shape=jax.ShapeDtypeStruct((B, C), jnp.float32),
            compiler_params=_compiler_params(("parallel",), 4 * tm * Cp * 4),
            cost_estimate=pl.CostEstimate(
                flops=2 * B * Cp,
                transcendentals=0,
                bytes_accessed=B * Cp * 4 + B * C * 4),
        )(logits, scale, shift)
        return y

    # Phase 2b: weighted CE with scalar accumulation across batch tiles.
    lbl = label.reshape(B, 1).astype(jnp.int32)
    loss = pl.pallas_call(
        functools.partial(_loss_kernel, C),
        grid=(nb,),
        in_specs=[row_spec, vec_spec, vec_spec, vec_spec,
                  pl.BlockSpec((tm, 1), lambda i: (i, 0))],
        out_specs=pl.BlockSpec((1, 1), lambda i: (0, 0)),
        out_shape=jax.ShapeDtypeStruct((1, 1), jnp.float32),
        scratch_shapes=[pltpu.VMEM((1, 1), jnp.float32),
                        pltpu.VMEM((1, 1), jnp.float32)],
        compiler_params=_compiler_params(("arbitrary",), 4 * tm * Cp * 4),
        cost_estimate=pl.CostEstimate(
            flops=10 * B * Cp,
            transcendentals=B * Cp,
            bytes_accessed=B * Cp * 4),
    )(logits, scale, shift, params["cw"], lbl)
    return loss[0, 0]


# ----------------------------- reference & test ----------------------------- #

def _reference(x, params, label=None):
    """Pure-JAX reference (mirrors the PyTorch module in training mode)."""
    w, b, gamma, beta, class_weight = params
    y = jnp.dot(x, w.T, precision=jax.lax.Precision.HIGHEST) + b
    mean = jnp.mean(y, axis=0, keepdims=True)
    var = jnp.mean((y - mean) ** 2, axis=0, keepdims=True)       # biased (torch BN)
    y = (y - mean) / jnp.sqrt(var + BN_EPS) * gamma + beta
    if label is None:
        return y
    cw = class_weight if class_weight is not None else jnp.ones((w.shape[0],), jnp.float32)
    logp = jax.nn.log_softmax(y, axis=-1)
    nll = -jnp.take_along_axis(logp, label[:, None], axis=-1)[:, 0]
    w_y = cw[label]
    return jnp.sum(w_y * nll) / jnp.sum(w_y)


if __name__ == "__main__":
    B, E, C = 32, 256, 20   # batch, embedding_size, num_class (C not a lane multiple)
    key = jax.random.PRNGKey(0)
    k_x, k_w, k_b, k_l = jax.random.split(key, 4)

    x = jax.random.normal(k_x, (B, E), jnp.float32)
    w = 0.1 * jax.random.normal(k_w, (C, E), jnp.float32)     # fc1.weight
    b = 0.1 * jax.random.normal(k_b, (C,), jnp.float32)       # fc1.bias
    gamma = jnp.full((C,), 1.2, jnp.float32)                  # bn1.weight
    beta = jnp.full((C,), 0.1, jnp.float32)                   # bn1.bias
    class_weight = jnp.linspace(0.5, 1.5, C, dtype=jnp.float32)
    label = jax.random.randint(k_l, (B,), 0, C, jnp.int32)

    prepared = prepare_params(w, b, gamma, beta, class_weight)

    # Small blocks on purpose so the multi-tile (batch x K) grid path is exercised.
    fwd = functools.partial(cce_forward, block_b=8, block_k=128)

    logits = jax.block_until_ready(fwd(x, prepared, None))
    loss = jax.block_until_ready(fwd(x, prepared, label))

    ref_params = (w, b, gamma, beta, class_weight)
    ref_logits = _reference(x, ref_params, None)
    ref_loss = _reference(x, ref_params, label)

    assert logits.shape == (B, C)
    assert jnp.allclose(logits, ref_logits, rtol=1e-3, atol=1e-3), \
        float(jnp.max(jnp.abs(logits - ref_logits)))
    assert jnp.allclose(loss, ref_loss, rtol=1e-3, atol=1e-3), \
        (float(loss), float(ref_loss))

    print("KERNEL_OK")
</pallas_src>

<mosaic_0001>
module attributes {stable_mosaic.version = 11 : i64} {
  func.func @_logits_stats_kernel(%arg0: i32, %arg1: i32, %arg2: memref<8x128xf32, #tpu.memory_space<vmem>>, %arg3: memref<128x128xf32, #tpu.memory_space<vmem>>, %arg4: memref<1x128xf32, #tpu.memory_space<vmem>>, %arg5: memref<8x128xf32, #tpu.memory_space<vmem>>, %arg6: memref<1x1x128xf32, #tpu.memory_space<vmem>>, %arg7: memref<1x1x128xf32, #tpu.memory_space<vmem>>, %arg8: memref<8x128xf32, #tpu.memory_space<vmem>>) attributes {dimension_semantics = [#tpu.dimension_semantics<parallel>, #tpu.dimension_semantics<arbitrary>], iteration_bounds = array<i64: 4, 2>, scalar_prefetch = 0 : i64, scratch_operands = 1 : i64, tpu.core_type = #tpu.core_type<tc>, window_params = [{transform_indices = @transform_0, window_bounds = array<i64: 8, 128>}, {transform_indices = @transform_1, window_bounds = array<i64: 128, 128>}, {pipeline_mode = #tpu.pipeline_mode<synchronous>, transform_indices = @transform_2, window_bounds = array<i64: 1, 128>}, {transform_indices = @transform_3, window_bounds = array<i64: 8, 128>}, {transform_indices = @transform_4, window_bounds = array<i64: 1, 1, 128>}, {transform_indices = @transform_5, window_bounds = array<i64: 1, 1, 128>}]} {
    %c0_i32 = arith.constant 0 : i32
    %0 = arith.cmpi eq, %arg1, %c0_i32 : i32
    %1 = arith.extui %0 : i1 to i32
    %c0_i32_0 = arith.constant 0 : i32
    %2 = arith.cmpi ne, %1, %c0_i32_0 : i32
    scf.if %2 {
      %cst_9 = arith.constant 0.000000e+00 : f32
      %12 = vector.broadcast %cst_9 : f32 to vector<8x128xf32>
      %c0_10 = arith.constant 0 : index
      %c0_11 = arith.constant 0 : index
      %13 = vector.load %arg8[%c0_10, %c0_11] : memref<8x128xf32, #tpu.memory_space<vmem>>, vector<8x128xf32>
      tpu.vector_store %arg8[%c0_10, %c0_11], %12 {strides = array<i32>} : memref<8x128xf32, #tpu.memory_space<vmem>>, vector<8x128xf32>,
    } else {
    }
    %c0 = arith.constant 0 : index
    %c0_1 = arith.constant 0 : index
    %3 = vector.load %arg8[%c0, %c0_1] : memref<8x128xf32, #tpu.memory_space<vmem>>, vector<8x128xf32>
    %c0_2 = arith.constant 0 : index
    %c0_3 = arith.constant 0 : index
    %4 = vector.load %arg2[%c0_2, %c0_3] : memref<8x128xf32, #tpu.memory_space<vmem>>, vector<8x128xf32>
    %c0_4 = arith.constant 0 : index
    %c0_5 = arith.constant 0 : index
    %5 = vector.load %arg3[%c0_4, %c0_5] : memref<128x128xf32, #tpu.memory_space<vmem>>, vector<128x128xf32>
    %cst = arith.constant dense<0.000000e+00> : vector<8x128xf32>
    %6 = tpu.matmul %4, %5, %cst {dimension_numbers = #tpu.dot_dimension_numbers<[1], [0], [0], [1], [0, 0, 1, 1], [], []>} : vector<8x128xf32>, vector<128x128xf32>, vector<8x128xf32> -> vector<8x128xf32>
    %7 = arith.addf %3, %6 : vector<8x128xf32>
    %c0_6 = arith.constant 0 : index
    %c0_7 = arith.constant 0 : index
    %8 = vector.load %arg8[%c0_6, %c0_7] : memref<8x128xf32, #tpu.memory_space<vmem>>, vector<8x128xf32>
    tpu.vector_store %arg8[%c0_6, %c0_7], %7 {strides = array<i32>} : memref<8x128xf32, #tpu.memory_space<vmem>>, vector<8x128xf32>,
    %c1_i32 = arith.constant 1 : i32
    %9 = arith.cmpi eq, %arg1, %c1_i32 : i32
    %10 = arith.extui %9 : i1 to i32
    %c0_i32_8 = arith.constant 0 : i32
    %11 = arith.cmpi ne, %10, %c0_i32_8 : i32
    scf.if %11 {
      %c0_9 = arith.constant 0 : index
      %c0_10 = arith.constant 0 : index
      %12 = vector.load %arg8[%c0_9, %c0_10] : memref<8x128xf32, #tpu.memory_space<vmem>>, vector<8x128xf32>
      %c0_11 = arith.constant 0 : index
      %c0_12 = arith.constant 0 : index
      %13 = vector.load %arg4[%c0_11, %c0_12] : memref<1x128xf32, #tpu.memory_space<vmem>>, vector<1x128xf32>
      %14 = vector.broadcast %13 : vector<1x128xf32> to vector<8x128xf32>
      %15 = arith.addf %12, %14 : vector<8x128xf32>
      %c0_13 = arith.constant 0 : index
      %c0_14 = arith.constant 0 : index
      %16 = vector.load %arg5[%c0_13, %c0_14] : memref<8x128xf32, #tpu.memory_space<vmem>>, vector<8x128xf32>
      tpu.vector_store %arg5[%c0_13, %c0_14], %15 {strides = array<i32>} : memref<8x128xf32, #tpu.memory_space<vmem>>, vector<8x128xf32>,
      %cst_15 = arith.constant dense<0.000000e+00> : vector<128xf32>
      %17 = vector.multi_reduction <add>, %15, %cst_15 [0] : vector<8x128xf32> to vector<128xf32>
      %18 = vector.shape_cast %17 : vector<128xf32> to vector<1x128xf32>
      %19 = vector.shape_cast %18 : vector<1x128xf32> to vector<1x1x128xf32>
      %c0_16 = arith.constant 0 : index
      %c0_17 = arith.constant 0 : index
      %c0_18 = arith.constant 0 : index
      %20 = vector.load %arg6[%c0_16, %c0_17, %c0_18] : memref<1x1x128xf32, #tpu.memory_space<vmem>>, vector<1x1x128xf32>
      tpu.vector_store %arg6[%c0_16, %c0_17, %c0_18], %19 {strides = array<i32>} : memref<1x1x128xf32, #tpu.memory_space<vmem>>, vector<1x1x128xf32>,
      %21 = arith.mulf %15, %15 : vector<8x128xf32>
      %cst_19 = arith.constant dense<0.000000e+00> : vector<128xf32>
      %22 = vector.multi_reduction <add>, %21, %cst_19 [0] : vector<8x128xf32> to vector<128xf32>
      %23 = vector.shape_cast %22 : vector<128xf32> to vector<1x128xf32>
      %24 = vector.shape_cast %23 : vector<1x128xf32> to vector<1x1x128xf32>
      %c0_20 = arith.constant 0 : index
      %c0_21 = arith.constant 0 : index
      %c0_22 = arith.constant 0 : index
      %25 = vector.load %arg7[%c0_20, %c0_21, %c0_22] : memref<1x1x128xf32, #tpu.memory_space<vmem>>, vector<1x1x128xf32>
      tpu.vector_store %arg7[%c0_20, %c0_21, %c0_22], %24 {strides = array<i32>} : memref<1x1x128xf32, #tpu.memory_space<vmem>>, vector<1x1x128xf32>,
    } else {
    }
    return
  }
  func.func @transform_0(%arg0: i32, %arg1: i32) -> (i32, i32) {
    %c0_i32 = arith.constant 0 : i32
    return %arg0, %arg1 : i32, i32
  }
  func.func @transform_1(%arg0: i32, %arg1: i32) -> (i32, i32) {
    %c0_i32 = arith.constant 0 : i32
    %c0_i32_0 = arith.constant 0 : i32
    return %arg1, %c0_i32 : i32, i32
  }
  func.func @transform_2(%arg0: i32, %arg1: i32) -> (i32, i32) {
    %c0_i32 = arith.constant 0 : i32
    %c0_i32_0 = arith.constant 0 : i32
    %c0_i32_1 = arith.constant 0 : i32
    return %c0_i32, %c0_i32_0 : i32, i32
  }
  func.func @transform_3(%arg0: i32, %arg1: i32) -> (i32, i32) {
    %c0_i32 = arith.constant 0 : i32
    %c0_i32_0 = arith.constant 0 : i32
    return %arg0, %c0_i32 : i32, i32
  }
  func.func @transform_4(%arg0: i32, %arg1: i32) -> (i32, i32, i32) {
    %c0_i32 = arith.constant 0 : i32
    %c0_i32_0 = arith.constant 0 : i32
    %c0_i32_1 = arith.constant 0 : i32
    return %arg0, %c0_i32, %c0_i32_0 : i32, i32, i32
  }
  func.func @transform_5(%arg0: i32, %arg1: i32) -> (i32, i32, i32) {
    %c0_i32 = arith.constant 0 : i32
    %c0_i32_0 = arith.constant 0 : i32
    %c0_i32_1 = arith.constant 0 : i32
    return %arg0, %c0_i32, %c0_i32_0 : i32, i32, i32
  }
}

</mosaic_0001>

<bundles_post_ra>
// kernel: tpu_custom_call.1
= control target key start
LH: loop header
LB: loop body
LE: loop exit
PB: predicated region body
PF: predicated region fallthrough
CT: control target
= control target key end

     0   :  { %s1400_s0 = inlined_call_operand.hbm [shape: f32[32,256], index: 0, kind: input, shape index: {}]   ;;  %s1401_s1 = inlined_call_operand.hbm [shape: f32[256,128], index: 1, kind: input, shape index: {}]   ;;  %s1402_s2 = inlined_call_operand.vmem [shape: f32[1,128], index: 2, kind: input, shape index: {}]   ;;  %s1403_s3 = inlined_call_operand.hbm [shape: f32[32,128], index: 3, kind: output, shape index: {0}]   ;;  %s1404_s4 = inlined_call_operand.hbm [shape: f32[4,1,128], index: 4, kind: output, shape index: {1}]   ;;  %s1405_s5 = inlined_call_operand.hbm [shape: f32[4,1,128], index: 5, kind: output, shape index: {2}]  }
   0x1   :  { %1415 = sst [smem:[#allocation26_spill]] %s1400_s0 }
   0x2   :  { %1416 = sst [smem:[#allocation27_spill]] %s1401_s1 }
   0x3   :  { %1417 = sst [smem:[#allocation28_spill]] %s1403_s3 }
   0x4   :  { %1418 = sst [smem:[#allocation29_spill]] %s1405_s5 }
   0x5   :  { %11 = vsyncpa [#allocation4], 0 }
   0x6   :  { %13 = vsyncpa [#allocation4 + $0x1], 0 }
   0x7   :  { %14 = vsyncpa [#allocation7], 0 }
   0x8   :  { %16 = vsyncpa [#allocation7 + $0x1], 0 }
   0x9   :  { %17 = vsyncpa [#allocation5], 0 }
   0xa   :  { %19 = vsyncpa [#allocation5 + $0x1], 0 }
   0xb   :  { %20 = vsyncpa [#allocation10], 0 }
   0xc   :  { %22 = vsyncpa [#allocation10 + $0x1], 0  ;;  %s1068_s18 = smov 0   ;;  %s1070_s19 = smov 0  }
   0xd   :  { %s1072_s20 = smov 0   ;;  %s1074_s21 = smov 0  }
   0xe   :  { %s1076_s22 = smov 0   ;;  %s1078_s23 = smov 0  }
   0xf   :  { %s1080_s24 = smov 0   ;;  %s1082_s25 = smov 0  }
  0x10   :  { %s1084_s26 = smov 0   ;;  %s1086_s27 = smov 0  }
  0x11   :  { %s1088_s28 = smov 0   ;;  %s1090_s29 = smov 0  }
  0x12   :  { %s1092_s30 = smov 0   ;;  %s1094_s6 = smov 0  }
  0x13 LB: > { %1419 = sst [smem:[#allocation16_spill]] %s981_s18  ;;  %s1137_s7 = sadd.s32 4294967295, %s1033_s6   ;;  %s1033_s6 = sphi %s1094_s6, %s28_s6   ;;  %s1029_s30 = sphi %s1092_s30, %s1453_s30   ;;  %s1025_s29 = sphi %s1090_s29, %s1462_s29   ;;  %s1021_s28 = sphi %s1088_s28, %s1451_s28   ;;  %s1017_s27 = sphi %s1086_s27, %s1461_s27   ;;  %s1013_s26 = sphi %s1084_s26, %s1450_s26   ;;  %s1009_s25 = sphi %s1082_s25, %s1460_s25   ;;  %s1005_s24 = sphi %s1080_s24, %s1459_s24   ;;  %s1001_s23 = sphi %s1078_s23, %s1458_s23   ;;  %s997_s22 = sphi %s1076_s22, %s1457_s22   ;;  %s993_s21 = sphi %s1074_s21, %s1456_s21   ;;  %s989_s20 = sphi %s1072_s20, %s1447_s20   ;;  %s985_s19 = sphi %s1070_s19, %s1455_s19   ;;  %s981_s18 = sphi %s1068_s18, %s1454_s18  }
  0x14   : > { %1420 = sst [smem:[#allocation17_spill]] %s989_s20  ;;  %s37_s9 = sadd.s32 1, %s1025_s29 }
  0x15   : > { %1421 = sst [smem:[#allocation18_spill]] %s1013_s26  ;;  %s40_s10 = sadd.s32 1, %s1029_s30 }
  0x16   : > { %1422 = sst [smem:[#allocation19_spill]] %s1029_s30  ;;  %p38_p0 = scmp.ge.s32.totalorder %s37_s9, 2 }
  0x17   : > { %s49_s11 = sadd.s32 1, %s1013_s26  ;;  %p56_p1 = scmp.ne.s32.totalorder %s1013_s26, %s1009_s25 }
  0x18   : > { %p57_p2 = scmp.eq.s32.totalorder %s1033_s6, 0  ;;  %s1464_s9 = smov (%p38_p0, %s37_s9), 0 }
  0x19   : > { %1423 = sst [smem:[#allocation20_spill]] %s1464_s9  ;;  %s1466_s10 = smov (!%p38_p0, %s40_s10), %s1029_s30 }
  0x1a   : > { %s45_s12 = ssub.s32 %s1025_s29, %s1464_s9  ;;  %p1153_p3 = por %p57_p2, %p56_p1 }
  0x1b   : > { %p42_p4 = scmp.ge.s32.totalorder %s1466_s10, 4  ;;  %p62_p5 = scmp.ne.s32.totalorder %s1009_s25, %s1005_s24 }
  0x1c   : > { %p63_p6 = scmp.eq.s32.totalorder %s1137_s7, 0  ;;  %p73_p7 = scmp.eq.s32.totalorder %s45_s12, 0 }
  0x1d   : > { %s1468_s10 = smov (%p42_p4, %s1466_s10), 0  ;;  %s75_s15 = sadd.s32 1, %s1001_s23 }
  0x1e   : > { %1425 = sst [smem:[#allocation21_spill]] %s1468_s10  ;;  %p1163_p8 = por %p63_p6, %p62_p5 }
  0x1f   : > { %s44_s16 = ssub.s32 %s1029_s30, %s1468_s10  ;;  %p82_p9 = scmp.ne.s32.totalorder %s1001_s23, %s997_s22 }
  0x20   : > { %s46_s17 = sor.u32 %s45_s12, %s44_s16  ;;  %p88_p10 = scmp.ne.s32.totalorder %s997_s22, %s993_s21 }
  0x21   : > { %p47_p11 = scmp.eq.s32.totalorder %s46_s17, 0  ;;  %p1176_p12 = por %p82_p9, %p57_p2 }
  0x22   : > { %s1181_s8 = scalar_select %p73_p7, %s1001_s23, %s75_s15  }
  0x23   : > { %s1184_s9 = scalar_select %p47_p11, %s1013_s26, %s49_s11  }
  0x24   : > { %1428 = sst [smem:[#allocation22_spill]] %s1181_s8  ;;  %p1188_p13 = por %p88_p10, %p63_p6 }
  0x25   : > { %1429 = sst [smem:[#allocation23_spill]] %s1184_s9  ;;  %p120_p0 = scmp.eq.s32.totalorder %s44_s16, 0 }
  0x26   : > { %s122_s21 = sadd.s32 1, %s989_s20  ;;  %p132_p1 = scmp.ne.s32.totalorder %s989_s20, %s985_s19 }
  0x27   : > { %s1196_s12 = scalar_select %p120_p0, %s989_s20, %s122_s21  }
  0x28   : > { %p133_p2 = scmp.eq.s32.totalorder %s1137_s7, 7  ;;  %p138_p4 = scmp.ne.s32.totalorder %s985_s19, %s981_s18 }
  0x29   : > { %1431 = sst [smem:[#allocation24_spill]] %s1196_s12  ;;  %s1432_s17 = sadd.s32 4294967294, %s1033_s6  }
  0x2a   : > { %p139_p5 = scmp.eq.s32.totalorder %s1432_s17, 7  ;;  %p1203_p7 = por %p133_p2, %p132_p1 }
  0x2b   : > { %p645_p6 = scmp.lt.s32.totalorder %s1033_s6, 8  ;;  %s214_s16 = sand.u32 1, %s1013_s26  }
  0x2c   : > { %p1208_p9 = por %p139_p5, %p138_p4  ;;  %s601_s21 = sshll.u32 %s214_s16, 3 }
  0x2d   : > { %s602_s9 = sshll.u32 %s1029_s30, 1  ;;  %s218_s12 = scalar_lea.vmem [#allocation3], %s601_s21 }
  0x2e   : > { %s1434_s15 = scalar_select %p1208_p9, 1, 0 }
  0x2f   : > { %s222_s8 = sadd.s32 %s1025_s29, %s602_s9  ;;  %s228_s20 = sshll.u32 %s218_s12, 4  ;;  %s229_s20 = int_to_ptr.vmem [resolvable:$true] %s228_s20 }
  0x30   : > { %1435 = sst [smem:[#allocation25_spill]] %s1434_s15  ;;  %s603_s17 = sshll.u32 %s222_s8, 3 }
  0x31   : > { %s1436_s0 = sld [smem:[#allocation26_spill]]  ;;  %p629_p10 = pnand %p645_p6, %p1153_p3 }
  0x32   : > { %p1226_p11 = pnand %p645_p6, %p1176_p12  ;;  %s215_s9 = scalar_lea.sflag [#allocation4], %s214_s16 }
  0x33   : > { %p607_p0 = scmp.ge.s32.totalorder %s1033_s6, 1  ;;  %p255_p1 = scmp.lt.s32.totalorder %s1033_s6, 9 }
  0x34   : > { %s235_s8 = sand.u32 1, %s1001_s23   ;;  %s617_s5 = sshll.u32 %s1025_s29, 7 }
  0x35   : > { %s604_s12 = sshll.u32 %s235_s8, 7  ;;  %p256_p2 = pnand %p607_p0, %p255_p1 }
  0x36   : > { %s239_s18 = scalar_lea.vmem [#allocation6], %s604_s12  ;;  %s1438_s1 = sld [smem:[#allocation27_spill]] }
  0x37   : > { %s224_s3 = scalar_lea.hbm %s1436_s0, %s603_s17  ;;  %s247_s13 = sshll.u32 %s239_s18, 4  ;;  %s248_s13 = int_to_ptr.vmem [resolvable:$true] %s247_s13 }
  0x38   : > { %s226_s15 = sshll.u32 %s224_s3, 4  ;;  %s236_s0 = scalar_lea.sflag [#allocation7], %s235_s8  ;;  %s227_s15 = int_to_ptr.hbm [resolvable:$true] %s226_s15 }
  0x39   : > { %631 = dma.hbm_to_vmem [thread:$0]  (!%p629_p10), %s227_s15, 128, %s229_s20, %s215_s9  }
  0x3a   : > { %s1035_s30 = smov 128   ;;  %s1036_s16 = smov 8  }
  0x3b   : > { %259 = sbr.rel (%p256_p2) target bundleno = 312 (0x138), region = 32  ;;  %s261_s20 = sand.u32 (!%p256_p2), 1, %s1009_s25  }
  0x3c   : > { %s244_s24 = scalar_lea.hbm %s1438_s1, %s617_s5  ;;  %s1240_s15 = sshll.u32 (!%p256_p2), %s261_s20, 3 }
  0x3d   : > { %s245_s17 = sshll.u32 %s244_s24, 4  ;;  %s262_s9 = scalar_lea.sflag (!%p256_p2), [#allocation4], %s261_s20  ;;  %s246_s17 = int_to_ptr.hbm [resolvable:$true] %s245_s17 }
  0x3e   : > { %634 = dma.hbm_to_vmem [thread:$0]  (!%p1226_p11), %s246_s17, 2048, %s248_s13, %s236_s0, %s1035_s30, %s1035_s30, %s1036_s16  }
  0x3f   : > { %s265_s12 = scalar_lea.vmem (!%p256_p2), [#allocation3], %s1240_s15 }
  0x40   : > { %964 = dma.done.wait (%p1163_p8), %s262_s9, 128  }
  0x41   : > { %966 = vsyncadd (%p1163_p8), %s262_s9, 4294967168  ;;  %s271_s8 = sand.u32 1, %s997_s22  }
  0x42   : > { %s609_s5 = sshll.u32 %s271_s8, 7  ;;  %s272_s26 = scalar_lea.sflag [#allocation7], %s271_s8 }
  0x43   : > { %s1248_s0 = scalar_lea.vmem [#allocation6], %s609_s5 }
  0x44   : > { %968 = dma.done.wait (%p1188_p13), %s272_s26, 2048  }
  0x45   : > { %970 = vsyncadd (%p1188_p13), %s272_s26, 4294965248  ;;  %s1255_s30 = sand.u32 1, %s985_s19   ;;  %p611_p3 = scmp.ne.s32.totalorder %s1017_s27, 0 }
  0x46   : > { %s610_s14 = sshll.u32 %s1255_s30, 3  ;;  %s309_s13 = scalar_lea.vmem [#allocation9], %s1255_s30 }
  0x47   : > { %s1258_s18 = scalar_lea.vmem [#allocation8], %s610_s14  ;;  %s315_s21 = scalar_lea.vmem [#allocation11], %s1255_s30 }
  0x48   : > { %320 = sbr.rel (%p611_p3) target bundleno = 79 (0x4f), region = 44 }
  0x4d   : > { %v1037_v0 = vmov 0.0  }
  0x4e   : > { %321 = vst [vmem:[#allocation2] sm:$0xff] %v1037_v0 }
  0x4f PF: > { %v339_v1 = vld [vmem:[%s1248_s0 + $0x78] sm:$0xff]  ;;  %v338_v2 = vld [vmem:[%s1248_s0 + $0x70] sm:$0xff]  ;;  %v337_v3 = vld [vmem:[%s1248_s0 + $0x68] sm:$0xff]  ;;  %p612_p8 = scmp.ne.s32.totalorder %s1017_s27, 1 }
  0x50   : > { %340 = vmatpush.msra.mxu0 %v339_v1  ;;  %v336_v4 = vld [vmem:[%s1248_s0 + $0x60] sm:$0xff]  ;;  %v335_v5 = vld [vmem:[%s1248_s0 + $0x58] sm:$0xff]  ;;  %v334_v6 = vld [vmem:[%s1248_s0 + $0x50] sm:$0xff] }
  0x51   : > { %v333_v7 = vld [vmem:[%s1248_s0 + $0x48] sm:$0xff]  ;;  %v332_v8 = vld [vmem:[%s1248_s0 + $0x40] sm:$0xff]  ;;  %v331_v9 = vld [vmem:[%s1248_s0 + $0x38] sm:$0xff] }
  0x52   : > { %341 = vmatpush.msra.mxu0 %v338_v2  ;;  %v330_v10 = vld [vmem:[%s1248_s0 + $0x30] sm:$0xff]  ;;  %v329_v11 = vld [vmem:[%s1248_s0 + $0x28] sm:$0xff]  ;;  %v328_v12 = vld [vmem:[%s1248_s0 + $0x20] sm:$0xff] }
  0x53   : > { %v327_v13 = vld [vmem:[%s1248_s0 + $0x18] sm:$0xff]  ;;  %v326_v14 = vld [vmem:[%s1248_s0 + $0x10] sm:$0xff]  ;;  %v325_v15 = vld [vmem:[%s1248_s0 + $0x8] sm:$0xff] }
  0x54   : > { %342 = vmatpush.msra.mxu0 %v337_v3  ;;  %v324_v16 = vld [vmem:[%s1248_s0] sm:$0xff]  ;;  %v323_v17 = vld [vmem:[%s265_s12] sm:$0xff] }
  0x55   : > { %v322_v18 = vld [vmem:[#allocation2] sm:$0xff] }
  0x56   : > { %343 = vmatpush.msra.mxu0 %v336_v4 }
  0x58   : > { %344 = vmatpush.msra.mxu0 %v335_v5 }
  0x5a   : > { %345 = vmatpush.msra.mxu0 %v334_v6 }
  0x5c   : > { %346 = vmatpush.msra.mxu0 %v333_v7 }
  0x5e   : > { %347 = vmatpush.msra.mxu0 %v332_v8 }
  0x60   : > { %348 = vmatpush.msra.mxu0 %v331_v9 }
  0x62   : > { %349 = vmatpush.msra.mxu0 %v330_v10 }
  0x64   : > { %350 = vmatpush.msra.mxu0 %v329_v11 }
  0x66   : > { %351 = vmatpush.msra.mxu0 %v328_v12 }
  0x68   : > { %352 = vmatpush.msra.mxu0 %v327_v13 }
  0x6a   : > { %353 = vmatpush.msra.mxu0 %v326_v14 }
  0x6c   : > { %354 = vmatpush.msra.mxu0 %v325_v15 }
  0x6e   : > { %355 = vmatpush.msra.mxu0 %v324_v16 }
  0x6f   : > { %356 = vmatmul.f32.vlgmr.msra.gmra.mxu0 %v323_v17 }
  0xeb   : > { %365 = sbr.rel (%p612_p8) target bundleno = 264 (0x108), region = 48 }
  0xec   : > { %v357_v19 = vpop.f32.mrf.mxu0 }
  0xed   : > { %v360_v20 = vadd.f32 %v357_v19, %v322_v18 }
  0xef   : > { %361 = vst [vmem:[#allocation2] sm:$0xff] %v360_v20 }
  0xf0   : > { %v762_v22 = vld [vmem:[%s1402_s2] ss:$0 sm:$0xff] }
  0xf6   : > { %v366_v21 = vld [vmem:[#allocation2] sm:$0xff] }
  0xf7   : > { %v371_v23 = vadd.f32 %v762_v22, %v366_v21 }
  0xf9   : > { %372 = vst [vmem:[%s1258_s18] sm:$0xff] %v371_v23  ;;  %v373_v24 = vrot.slane %v371_v23, 4  ;;  %v380_v25 = vmul.f32 %v371_v23, %v371_v23 }
  0xfb   : > { %v374_v26 = vadd.f32 %v373_v24, %v371_v23  ;;  %v381_v27 = vrot.slane %v380_v25, 4 }
  0xfd   : > { %v375_v28 = vrot.slane %v374_v26, 2  ;;  %v382_v29 = vadd.f32 %v381_v27, %v380_v25 }
  0xff   : > { %v376_v30 = vadd.f32 %v375_v28, %v374_v26  ;;  %v383_v31 = vrot.slane %v382_v29, 2 }
 0x101   : > { %v377_v32 = vrot.slane %v376_v30, 1  ;;  %v384_v33 = vadd.f32 %v383_v31, %v382_v29 }
 0x103   : > { %v378_v34 = vadd.f32 %v377_v32, %v376_v30  ;;  %v385_v35 = vrot.slane %v384_v33, 1 }
 0x105   : > { %379 = vst [vmem:[%s309_s13] sm:$0x1] %v378_v34  ;;  %v386_v36 = vadd.f32 %v385_v35, %v384_v33 }
 0x107   : > { %387 = vst [vmem:[%s315_s21] sm:$0x1] %v386_v36 }
 0x108 PF: > { %s393_s27 = sand.u32 1, %s1137_s7   ;;  %s420_s16 = scalar_lea.hbm %s1404_s4, %s1021_s28 }
 0x109   : > { %s422_s20 = sshll.u32 %s309_s13, 4  ;;  %s424_s15 = sshll.u32 %s420_s16, 4  ;;  %s423_s20 = int_to_ptr.vmem [resolvable:$true] %s422_s20  ;;  %s425_s15 = int_to_ptr.hbm [resolvable:$true] %s424_s15 }
 0x10a   : > { %s1297_s9 = scalar_lea.sflag [#allocation10], %s393_s27  ;;  %s837_s12 = sshra.s32 %s425_s15, 4  ;;  %s838_s12 = int_to_ptr.hbm [resolvable:$true] %s837_s12 }
 0x10b   : > { %s839_s8 = scalar_lea.hbm %s838_s12, 1  ;;  %s843_s26 = scalar_lea.hbm %s1404_s4, 4 }
 0x10c   : > { %p840_p12 = scmp.ne.s32.totalorder %s838_s12, %s839_s8  ;;  %p844_p5 = scmp.lt.s32.totalorder %s838_s12, %s1404_s4 }
 0x10d   : > { %p845_p6 = scmp.lt.s32.totalorder %s843_s26, %s839_s8 }
 0x10e   : > { %p841_p13 = pnand %p840_p12, %p1203_p7 }
 0x10f   : > { %p846_p10 = por %p845_p6, %p844_p5 }
 0x110   : > { %p842_p4 = pneg %p841_p13 }
 0x112   : > { %p847_p11 = pnand %p846_p10, %p842_p4 }
 0x114   : > { %850 = shalt.err (!%p847_p11)
}
 0x115   : > { %623 = dma.vmem_to_hbm [thread:$0]  (%p1203_p7), %s423_s20, 16, %s425_s15, %s1297_s9  }
 0x116   : > { %s614_s13 = sshll.u32 %s1021_s28, 3  ;;  %s409_s10 = sshll.u32 %s1258_s18, 4  ;;  %s410_s10 = int_to_ptr.vmem [resolvable:$true] %s409_s10 }
 0x117   : > { %s1439_s24 = sld [smem:[#allocation28_spill]]  ;;  %s1321_s0 = sshll.u32 %s315_s21, 4  ;;  %s436_s0 = int_to_ptr.vmem [resolvable:$true] %s1321_s0 }
 0x118   : > { %s1441_s7 = sld [smem:[#allocation29_spill]]  ;;  %s389_s14 = scalar_lea.sflag [#allocation5], %s1255_s30 }
 0x11d   : > { %s1440_s17 = smov %s1439_s24  ;;  %s407_s16 = scalar_lea.hbm %s1439_s24, %s614_s13 }
 0x11e   : > { %s411_s12 = sshll.u32 %s407_s16, 4  ;;  %s433_s26 = scalar_lea.hbm %s1441_s7, %s1021_s28  ;;  %s412_s12 = int_to_ptr.hbm [resolvable:$true] %s411_s12 }
 0x11f   : > { %s865_s1 = sshra.s32 %s412_s12, 4  ;;  %s871_s13 = scalar_lea.hbm %s1440_s17, 32  ;;  %s866_s1 = int_to_ptr.hbm [resolvable:$true] %s865_s1 }
 0x120   : > { %s867_s20 = scalar_lea.hbm %s866_s1, 8  ;;  %p872_p3 = scmp.lt.s32.totalorder %s866_s1, %s1440_s17 }
 0x121   : > { %p868_p0 = scmp.ne.s32.totalorder %s866_s1, %s867_s20  ;;  %p873_p8 = scmp.lt.s32.totalorder %s871_s13, %s867_s20 }
 0x123   : > { %p869_p1 = pnand %p868_p0, %p1203_p7  ;;  %p874_p12 = por %p873_p8, %p872_p3 }
 0x125   : > { %p870_p2 = pneg %p869_p1 }
 0x127   : > { %p875_p13 = pnand %p874_p12, %p870_p2 }
 0x129   : > { %878 = shalt.err (!%p875_p13)
}
 0x12a   : > { %622 = dma.vmem_to_hbm [thread:$0]  (%p1203_p7), %s410_s10, 128, %s412_s12, %s389_s14  }
 0x12b   : > { %s437_s28 = sshll.u32 %s433_s26, 4  ;;  %s899_s16 = scalar_lea.hbm %s1441_s7, 4  ;;  %s438_s28 = int_to_ptr.hbm [resolvable:$true] %s437_s28 }
 0x12c   : > { %s893_s30 = sshra.s32 %s438_s28, 4  ;;  %s894_s30 = int_to_ptr.hbm [resolvable:$true] %s893_s30 }
 0x12d   : > { %s895_s21 = scalar_lea.hbm %s894_s30, 1  ;;  %p900_p10 = scmp.lt.s32.totalorder %s894_s30, %s1441_s7 }
 0x12e   : > { %p896_p4 = scmp.ne.s32.totalorder %s894_s30, %s895_s21  ;;  %p901_p11 = scmp.lt.s32.totalorder %s899_s16, %s895_s21 }
 0x130   : > { %p897_p5 = pnand %p896_p4, %p1203_p7  ;;  %p902_p0 = por %p901_p11, %p900_p10 }
 0x132   : > { %p898_p6 = pneg %p897_p5 }
 0x134   : > { %p903_p1 = pnand %p902_p0, %p898_p6 }
 0x136   : > { %906 = shalt.err (!%p903_p1)
}
 0x137   : > { %624 = dma.vmem_to_hbm [thread:$0]  (%p1203_p7), %s436_s0, 16, %s438_s28, %s1297_s9  }
 0x138 PF: > { %s1442_s10 = sld [smem:[#allocation16_spill]]  ;;  %p646_p2 = scmp.ge.s32.totalorder %s1033_s6, 2 }
 0x13a   : > { %p636_p3 = pnand %p646_p2, %p1208_p9 }
 0x13c   : > { %p637_p8 = pneg %p636_p3 }
 0x13e   : > { %s449_s26 = sand.u32 1, %s1442_s10  }
 0x13f   : > { %s450_s14 = scalar_lea.sflag [#allocation5], %s449_s26 }
 0x140   : > { %972 = dma.done.wait (%p637_p8), %s450_s14, 128  }
 0x141   : > { %974 = vsyncadd (%p637_p8), %s450_s14, 4294967168  ;;  %s1444_s20 = sadd.s32 4294967294, %s1033_s6  }
 0x142   : > { %s459_s18 = sand.u32 1, %s1444_s20  }
 0x143   : > { %s460_s15 = scalar_lea.sflag [#allocation10], %s459_s18 }
 0x144   : > { %976 = dma.done.wait (%p637_p8), %s460_s15, 32  }
 0x145   : > { %978 = vsyncadd (%p637_p8), %s460_s15, 4294967264  ;;  %s28_s6 = sadd.s32 1, %s1033_s6   ;;  %s1446_s9 = sld [smem:[#allocation17_spill]] }
 0x146   : > { %p1353_p7 = scmp.ge.s32.totalorder %s28_s6, 10   ;;  %s1447_s20 = sld [smem:[#allocation24_spill]] }
 0x147   : > { %s1448_s0 = sld [smem:[#allocation22_spill]]  ;;  %s1454_s18 = smov %s985_s19 }
 0x148   : > { %s1449_s13 = sld [smem:[#allocation18_spill]]  ;;  %s1456_s21 = smov %s997_s22 }
 0x149   : > { %s1450_s26 = sld [smem:[#allocation23_spill]]  ;;  %s1457_s22 = smov %s1001_s23 }
 0x14a   : > { %s1451_s28 = sld [smem:[#allocation19_spill]]  ;;  %s1459_s24 = smov %s1009_s25 }
 0x14b   : > { %s1452_s3 = sld [smem:[#allocation20_spill]]  ;;  %s1455_s19 = smov %s1446_s9 }
 0x14c   : > { %s1453_s30 = sld [smem:[#allocation21_spill]]  ;;  %s1461_s27 = smov %s1025_s29 }
 0x14d   : > { %s1458_s23 = smov %s1448_s0  ;;  %27 = sbr.rel (!%p1353_p7) target bundleno = 19 (0x13), region = 130 }
 0x14e   : > { %s1460_s25 = smov %s1449_s13 }
 0x151   : > { %s1462_s29 = smov %s1452_s3 }
 0x152   :  { %474 = vsyncpa [#allocation4], 1 }
 0x153   :  { %476 = vsyncpa [#allocation4 + $0x1], 1 }
 0x154   :  { %477 = vsyncpa [#allocation7], 1 }
 0x155   :  { %479 = vsyncpa [#allocation7 + $0x1], 1 }
 0x156   :  { %480 = vsyncpa [#allocation5], 1 }
 0x157   :  { %482 = vsyncpa [#allocation5 + $0x1], 1 }
 0x158   :  { %483 = vsyncpa [#allocation10], 1 }
 0x159   :  { %485 = vsyncpa [#allocation10 + $0x1], 1 }

</bundles_post_ra>
